<compile_context>
chip_gen: v6e
topology: v6e:2x2x1
jax: 0.10.0
libtpu: 0.0.40
codegen_flags: <defaults>
</compile_context>

<pallas_src>
import functools

import jax
import jax.numpy as jnp
from jax.experimental import pallas as pl
from jax.experimental.pallas import tpu as pltpu


# ---------------------------------------------------------------------------
# Kernels
# ---------------------------------------------------------------------------

def _epilogue(acc, bias, o_ref, *, tn, activation):
    """acc: (tm, 2*tn) f32 = [h | g] pre-bias. Writes (tm, tn) output tile."""
    acc = acc + bias                        # bias broadcast over rows (f32)
    h = acc[:, :tn]                         # lane-aligned static split
    g = acc[:, tn:]
    if activation is not None:
        h = activation(h)
    # sigmoid(g) = 1 / (1 + exp(-g)): exp + approx reciprocal run on the EUP
    # slot, keeping the VALU free for the bias adds and the h*g multiply.
    g = pl.reciprocal(1.0 + jnp.exp(-g), approx=True)
    o_ref[...] = (h * g).astype(o_ref.dtype)


def _gated_dense_kernel_1k(x_ref, w_ref, b_ref, o_ref, *, tn, activation):
    """Single k-step: whole reduction in one dot, no scratch accumulator."""
    acc = jnp.dot(x_ref[...], w_ref[...], preferred_element_type=jnp.float32)
    _epilogue(acc, b_ref[...], o_ref, tn=tn, activation=activation)


def _gated_dense_kernel_nk(x_ref, w_ref, b_ref, o_ref, acc_ref, *, tn, activation):
    """General k-reduction with a resident (tm, 2*tn) f32 accumulator."""
    k = pl.program_id(2)

    @pl.when(k == 0)
    def _():
        acc_ref[...] = jnp.zeros_like(acc_ref)

    acc_ref[...] += jnp.dot(x_ref[...], w_ref[...],
                            preferred_element_type=jnp.float32)

    @pl.when(k == pl.num_programs(2) - 1)
    def _():
        _epilogue(acc_ref[...], b_ref[...], o_ref, tn=tn, activation=activation)


# ---------------------------------------------------------------------------
# Parameter preparation (ONE-TIME, at parameter-load/init time)
# ---------------------------------------------------------------------------

def _default_tn(d_out):
    # Prefer >= 2 N-blocks (2-TC sharding on v7x); effective MXU width per
    # step is 2*tn, so tn=128 still gives a 256-wide matmul after fusion.
    if d_out % 256 == 0 and d_out // 256 >= 2:
        return 256
    if d_out % 128 == 0 and d_out // 128 >= 2:
        return 128
    return d_out


def prepare_gated_dense_params(wh, bh, wg, bg, *, tn=None, compute_dtype=None):
    """Transpose + block-interleave + (optionally) cast weights, ONCE.

    wh/wg: [D_out, D_in] (PyTorch nn.Linear layout), bh/bg: [D_out].
    Returns a dict holding the fused weight [D_in, (D_out/tn)*2*tn], fused
    f32 bias row [1, (D_out/tn)*2*tn], and the layout metadata.
    """
    d_out, d_in = wh.shape
    tn = _default_tn(d_out) if tn is None else tn
    assert d_out % tn == 0, "tn must divide D_out"
    assert tn % 128 == 0 or tn == d_out, "tn should be lane-aligned (or full D_out)"
    nj = d_out // tn

    wdt = wh.dtype if compute_dtype is None else compute_dtype
    wh_t = wh.T.astype(wdt)                 # [D_in, D_out]
    wg_t = wg.T.astype(wdt)

    # Block-interleave so each (tk, 2*tn) tile j holds [Wh_j | Wg_j].
    w_fused = jnp.concatenate(
        [wh_t.reshape(d_in, nj, 1, tn), wg_t.reshape(d_in, nj, 1, tn)], axis=2
    ).reshape(d_in, nj * 2 * tn)
    b_fused = jnp.concatenate(
        [bh.astype(jnp.float32).reshape(nj, 1, tn),
         bg.astype(jnp.float32).reshape(nj, 1, tn)], axis=1
    ).reshape(1, nj * 2 * tn)

    return {"w": w_fused, "b": b_fused, "tn": tn, "d_out": d_out, "d_in": d_in}


# ---------------------------------------------------------------------------
# Wrapper
# ---------------------------------------------------------------------------

def _default_tm(batch):
    if batch <= 256:
        return batch
    for cand in (256, 128, 64, 32, 16, 8):
        if batch % cand == 0:
            return cand
    return batch


def _default_tk(d_in):
    if d_in <= 512:
        return d_in                         # no reduction grid axis at all
    for cand in (512, 384, 256, 128):
        if d_in % cand == 0:
            return cand
    return d_in


def gated_dense(x, params, *, activation=None, tm=None, tk=None, out_dtype=None):
    """x: [B, D_in]; params: output of prepare_gated_dense_params."""
    w, b = params["w"], params["b"]
    tn, d_out, d_in = params["tn"], params["d_out"], params["d_in"]

    batch = x.shape[0]
    assert x.shape[1] == d_in
    out_dtype = x.dtype if out_dtype is None else out_dtype
    if x.dtype != w.dtype:                  # e.g. bf16 compute path
        x = x.astype(w.dtype)

    tm = _default_tm(batch) if tm is None else tm
    tk = _default_tk(d_in) if tk is None else tk
    assert batch % tm == 0 and d_in % tk == 0 and d_out % tn == 0

    nj = d_out // tn
    nk = d_in // tk
    two_tn = 2 * tn

    if nk == 1:
        kernel = functools.partial(_gated_dense_kernel_1k, tn=tn,
                                   activation=activation)
        grid = (batch // tm, nj)
        in_specs = [
            pl.BlockSpec((tm, tk), lambda i, j: (i, 0)),        # x tile
            pl.BlockSpec((tk, two_tn), lambda i, j: (0, j)),    # fused W tile
            pl.BlockSpec((1, two_tn), lambda i, j: (0, j)),     # fused bias
        ]
        out_specs = pl.BlockSpec((tm, tn), lambda i, j: (i, j))
        scratch = []
        dims = ("parallel", "parallel")
    else:
        kernel = functools.partial(_gated_dense_kernel_nk, tn=tn,
                                   activation=activation)
        grid = (batch // tm, nj, nk)
        in_specs = [
            pl.BlockSpec((tm, tk), lambda i, j, k: (i, k)),     # x tile
            pl.BlockSpec((tk, two_tn), lambda i, j, k: (k, j)), # fused W tile
            pl.BlockSpec((1, two_tn), lambda i, j, k: (0, j)),  # fused bias
        ]
        out_specs = pl.BlockSpec((tm, tn), lambda i, j, k: (i, j))
        scratch = [pltpu.VMEM((tm, two_tn), jnp.float32)]
        dims = ("parallel", "parallel", "arbitrary")

    # Explicit VMEM budget: double-buffered x / W / bias / out tiles + f32 acc.
    itm_x = x.dtype.itemsize
    itm_w = w.dtype.itemsize
    itm_o = jnp.dtype(out_dtype).itemsize
    needed = (2 * tm * tk * itm_x
              + 2 * tk * two_tn * itm_w
              + 2 * two_tn * 4
              + 2 * tm * tn * itm_o
              + (tm * two_tn * 4 if nk > 1 else 0))
    vmem_limit = min(64 * 1024 * 1024, max(32 * 1024 * 1024, 2 * needed))

    return pl.pallas_call(
        kernel,
        out_shape=jax.ShapeDtypeStruct((batch, d_out), out_dtype),
        grid_spec=pltpu.PrefetchScalarGridSpec(
            num_scalar_prefetch=0,
            grid=grid,
            in_specs=in_specs,
            out_specs=out_specs,
            scratch_shapes=scratch,
        ),
        compiler_params=pltpu.CompilerParams(
            dimension_semantics=dims,
            vmem_limit_bytes=int(vmem_limit)),
    )(x, w, b)


# ---------------------------------------------------------------------------
# Reference + test
# ---------------------------------------------------------------------------

def gated_dense_ref(x, wh, bh, wg, bg, activation=None):
    h = x @ wh.T + bh
    if activation is not None:
        h = activation(h)
    g = jax.nn.sigmoid(x @ wg.T + bg)
    return h * g


if __name__ == "__main__":
    key = jax.random.PRNGKey(0)

    B, D_in, D_out = 16, 256, 256   # small shapes consistent with a dense layer

    k_x, k_wh, k_bh, k_wg, k_bg = jax.random.split(key, 5)
    x = jax.random.normal(k_x, (B, D_in), dtype=jnp.float32)

    # Deterministic PyTorch-style Linear init: U(-1/sqrt(in), 1/sqrt(in)).
    bound = 1.0 / (D_in ** 0.5)
    wh = jax.random.uniform(k_wh, (D_out, D_in), jnp.float32, -bound, bound)
    bh = jax.random.uniform(k_bh, (D_out,), jnp.float32, -bound, bound)
    wg = jax.random.uniform(k_wg, (D_out, D_in), jnp.float32, -bound, bound)
    bg = jax.random.uniform(k_bg, (D_out,), jnp.float32, -bound, bound)

    ref = gated_dense_ref(x, wh, bh, wg, bg, activation=None)
    ref_t = gated_dense_ref(x, wh, bh, wg, bg, activation=jnp.tanh)

    # --- f32 compute, single-k fast path (tk = D_in, no accumulator scratch) ---
    params_f32 = prepare_gated_dense_params(wh, bh, wg, bg)
    out = jax.block_until_ready(gated_dense(x, params_f32, activation=None))
    assert jnp.allclose(out, ref, atol=2e-3, rtol=2e-3), "mismatch vs reference"

    # --- f32 compute, multi-k accumulator path + fused tanh activation ---
    out_t = jax.block_until_ready(
        gated_dense(x, params_f32, activation=jnp.tanh, tk=128))
    assert jnp.allclose(out_t, ref_t, atol=2e-3, rtol=2e-3), "mismatch (tanh) vs reference"

    # --- bf16 compute (f32 accumulation), weights cast once at prep time ---
    params_bf16 = prepare_gated_dense_params(wh, bh, wg, bg,
                                             compute_dtype=jnp.bfloat16)
    out_bf16 = jax.block_until_ready(gated_dense(x, params_bf16, activation=None))
    assert out_bf16.dtype == x.dtype
    assert jnp.allclose(out_bf16, ref, atol=5e-2, rtol=5e-2), "mismatch (bf16) vs reference"

    print("KERNEL_OK")
</pallas_src>

<mosaic_0001>
module attributes {stable_mosaic.version = 11 : i64} {
  func.func @_gated_dense_kernel_1k(%arg0: i32, %arg1: i32, %arg2: memref<16x256xf32, #tpu.memory_space<vmem>>, %arg3: memref<256x256xf32, #tpu.memory_space<vmem>>, %arg4: memref<1x256xf32, #tpu.memory_space<vmem>>, %arg5: memref<16x128xf32, #tpu.memory_space<vmem>>) attributes {dimension_semantics = [#tpu.dimension_semantics<parallel>, #tpu.dimension_semantics<parallel>], iteration_bounds = array<i64: 1, 2>, scalar_prefetch = 0 : i64, scratch_operands = 0 : i64, tpu.core_type = #tpu.core_type<tc>, window_params = [{transform_indices = @transform_0, window_bounds = array<i64: 16, 256>}, {transform_indices = @transform_1, window_bounds = array<i64: 256, 256>}, {transform_indices = @transform_2, window_bounds = array<i64: 1, 256>}, {transform_indices = @transform_3, window_bounds = array<i64: 16, 128>}]} {
    %c0 = arith.constant 0 : index
    %c0_0 = arith.constant 0 : index
    %0 = vector.load %arg2[%c0, %c0_0] : memref<16x256xf32, #tpu.memory_space<vmem>>, vector<16x256xf32>
    %c0_1 = arith.constant 0 : index
    %c0_2 = arith.constant 0 : index
    %1 = vector.load %arg3[%c0_1, %c0_2] : memref<256x256xf32, #tpu.memory_space<vmem>>, vector<256x256xf32>
    %cst = arith.constant dense<0.000000e+00> : vector<16x256xf32>
    %2 = tpu.matmul %0, %1, %cst {dimension_numbers = #tpu.dot_dimension_numbers<[1], [0], [0], [1], [0, 0, 1, 1], [], []>} : vector<16x256xf32>, vector<256x256xf32>, vector<16x256xf32> -> vector<16x256xf32>
    %c0_3 = arith.constant 0 : index
    %c0_4 = arith.constant 0 : index
    %3 = vector.load %arg4[%c0_3, %c0_4] : memref<1x256xf32, #tpu.memory_space<vmem>>, vector<1x256xf32>
    %4 = vector.broadcast %3 : vector<1x256xf32> to vector<16x256xf32>
    %5 = arith.addf %2, %4 : vector<16x256xf32>
    %6 = vector.extract_strided_slice %5 {offsets = [0, 0], sizes = [16, 128], strides = [1, 1]} : vector<16x256xf32> to vector<16x128xf32>
    %7 = vector.extract_strided_slice %5 {offsets = [0, 128], sizes = [16, 128], strides = [1, 1]} : vector<16x256xf32> to vector<16x128xf32>
    %cst_5 = arith.constant 0.000000e+00 : f32
    %8 = vector.broadcast %cst_5 : f32 to vector<16x128xf32>
    %9 = arith.subf %8, %7 : vector<16x128xf32>
    %10 = math.exp %9 : vector<16x128xf32>
    %cst_6 = arith.constant 1.000000e+00 : f32
    %11 = vector.broadcast %cst_6 : f32 to vector<16x128xf32>
    %12 = arith.addf %11, %10 : vector<16x128xf32>
    %13 = tpu.reciprocal %12 {approx = true} : vector<16x128xf32> -> vector<16x128xf32>
    %14 = arith.mulf %6, %13 : vector<16x128xf32>
    %c0_7 = arith.constant 0 : index
    %c0_8 = arith.constant 0 : index
    %15 = vector.load %arg5[%c0_7, %c0_8] : memref<16x128xf32, #tpu.memory_space<vmem>>, vector<16x128xf32>
    tpu.vector_store %arg5[%c0_7, %c0_8], %14 {strides = array<i32>} : memref<16x128xf32, #tpu.memory_space<vmem>>, vector<16x128xf32>,
    return
  }
  func.func @transform_0(%arg0: i32, %arg1: i32) -> (i32, i32) {
    %c0_i32 = arith.constant 0 : i32
    %c0_i32_0 = arith.constant 0 : i32
    return %arg0, %c0_i32 : i32, i32
  }
  func.func @transform_1(%arg0: i32, %arg1: i32) -> (i32, i32) {
    %c0_i32 = arith.constant 0 : i32
    %c0_i32_0 = arith.constant 0 : i32
    return %c0_i32, %arg1 : i32, i32
  }
  func.func @transform_2(%arg0: i32, %arg1: i32) -> (i32, i32) {
    %c0_i32 = arith.constant 0 : i32
    %c0_i32_0 = arith.constant 0 : i32
    return %c0_i32, %arg1 : i32, i32
  }
  func.func @transform_3(%arg0: i32, %arg1: i32) -> (i32, i32) {
    %c0_i32 = arith.constant 0 : i32
    return %arg0, %arg1 : i32, i32
  }
}

</mosaic_0001>

<bundles_post_ra>
// kernel: tpu_custom_call.1
= control target key start
LH: loop header
LB: loop body
LE: loop exit
PB: predicated region body
PF: predicated region fallthrough
CT: control target
= control target key end

     0   :  { %s1228_s0 = inlined_call_operand.hbm [shape: f32[16,256], index: 0, kind: input, shape index: {}]   ;;  %s1229_s1 = inlined_call_operand.hbm [shape: f32[256,512], index: 1, kind: input, shape index: {}]   ;;  %s1230_s2 = inlined_call_operand.hbm [shape: f32[1,512], index: 2, kind: input, shape index: {}]   ;;  %s1231_s3 = inlined_call_operand.hbm [shape: f32[16,256], index: 3, kind: output, shape index: {}]  }
   0x1   :  { %1237 = sst [smem:[#allocation12_spill]] %s1229_s1 }
   0x2   :  { %8 = vsyncpa [#allocation3], 0 }
   0x3   :  { %9 = vsyncpa [#allocation6], 0 }
   0x4   :  { %11 = vsyncpa [#allocation6 + $0x1], 0 }
   0x5   :  { %12 = vsyncpa [#allocation4], 0 }
   0x6   :  { %14 = vsyncpa [#allocation4 + $0x1], 0  ;;  %s946_s12 = smov 0   ;;  %s948_s13 = smov 0  }
   0x7   :  { %s950_s14 = smov 0   ;;  %s952_s15 = smov 0  }
   0x8   :  { %s954_s16 = smov 0   ;;  %s956_s17 = smov 0  }
   0x9 LB: > { %s29_s18 = sadd.s32 1, %s910_s16  ;;  %s65_s19 = sadd.s32 1, %s902_s14  ;;  %s914_s17 = sphi %s956_s17, %s20_s17   ;;  %s910_s16 = sphi %s954_s16, %s1258_s16   ;;  %s906_s15 = sphi %s952_s15, %s1257_s15   ;;  %s902_s14 = sphi %s950_s14, %s1256_s14   ;;  %s898_s13 = sphi %s948_s13, %s1255_s13   ;;  %s894_s12 = sphi %s946_s12, %s1254_s12  }
   0xa   : > { %p30_p0 = scmp.ge.s32.totalorder %s29_s18, 2  ;;  %p72_p1 = scmp.ne.s32.totalorder %s902_s14, %s898_s13 }
   0xb   : > { %p73_p2 = scmp.eq.s32.totalorder %s914_s17, 0  ;;  %p682_p6 = scmp.lt.s32.totalorder %s914_s17, 2 }
   0xc   : > { %s1260_s18 = smov (%p30_p0, %s29_s18), 0  ;;  %s173_s22 = sand.u32 1, %s914_s17  }
   0xd   : > { %p986_p3 = por %p73_p2, %p72_p1  ;;  %s62_s21 = ssub.s32 %s910_s16, %s1260_s18 }
   0xe   : > { %p63_p5 = scmp.eq.s32.totalorder %s62_s21, 0  ;;  %s175_s23 = sand.u32 1, %s902_s14  }
   0xf   : > { %s575_s25 = sshll.u32 %s175_s23, 9  ;;  %s590_s26 = sshll.u32 %s910_s16, 8 }
  0x10   : > { %s997_s24 = scalar_select %p63_p5, %s902_s14, %s65_s19  }
  0x11   : > { %s1239_s1 = sld [smem:[#allocation12_spill]]  ;;  %s177_s30 = scalar_lea.vmem [#allocation5], %s575_s25 }
  0x12   : > { %s184_s4 = sshll.u32 %s177_s30, 4  ;;  %p1007_p7 = pnand %p682_p6, %p986_p3  ;;  %s185_s4 = int_to_ptr.vmem [resolvable:$true] %s184_s4 }
  0x13   : > { %s1011_s6 = scalar_lea.sflag [#allocation6], %s173_s22  ;;  %s761_s7 = scalar_lea.vmem %s185_s4, 8192 }
  0x14   : > { %p750_p8 = pneg %p1007_p7  ;;  %p762_p9 = scmp.ne.s32.totalorder %s185_s4, %s761_s7 }
  0x15   : > { %s916_s8 = smov [#allocation5]  }
  0x16   : > { %p764_p10 = pnand %p762_p9, %p750_p8  ;;  %s766_s9 = sshll.u32 %s916_s8, 4  ;;  %s767_s9 = int_to_ptr.vmem [resolvable:$false] %s766_s9 }
  0x17   : > { %s183_s29 = scalar_lea.hbm %s1239_s1, %s590_s26  ;;  %s768_s10 = scalar_lea.vmem %s767_s9, 16384 }
  0x18   : > { %p765_p11 = pneg %p764_p10  ;;  %p769_p12 = scmp.lt.s32.totalorder %s185_s4, %s767_s9 }
  0x19   : > { %p770_p13 = scmp.lt.s32.totalorder %s768_s10, %s761_s7 }
  0x1b   : > { %p771_p0 = por %p770_p13, %p769_p12 }
  0x1d   : > { %p772_p2 = pnand %p771_p0, %p765_p11 }
  0x1f   : > { %775 = shalt.err (!%p772_p2)
}
  0x20   : > { %s917_s11 = smov 512   ;;  %s1232_s19 = smov 256  }
  0x21   : > { %s1233_s20 = smov 16   ;;  %s1024_s21 = sadd.s32 4294967295, %s914_s17  }
  0x22   : > { %673 = dma.hbm_to_vmem [thread:$0]  (!%p1007_p7), %s183_s29, 8192, %s185_s4, %s1011_s6, %s917_s11, %s1232_s19, %s1233_s20  }
  0x23   : > { %s571_s22 = sadd.s32 4294967294, %s914_s17   ;;  %p78_p3 = scmp.ne.s32.totalorder %s898_s13, %s894_s12 }
  0x24   : > { %p1235_p5 = scmp.eq.s32.totalorder %s1024_s21, 0  ;;  %p130_p6 = scmp.eq.s32.totalorder %s1024_s21, 1 }
  0x25   : > { %p136_p9 = scmp.eq.s32.totalorder %s571_s22, 1  ;;  %p572_p11 = scmp.ge.s32.totalorder %s914_s17, 1 }
  0x26   : > { %p1033_p10 = por %p1235_p5, %p78_p3  ;;  %p1041_p12 = por %p130_p6, %p72_p1 }
  0x27   : > { %p1045_p13 = por %p136_p9, %p78_p3  ;;  %p143_p0 = scmp.lt.s32.totalorder %s914_s17, 3 }
  0x28   : > { %s1241_s25 = scalar_select %p1033_p10, 1, 0 }
  0x29   : > { %s1242_s26 = scalar_select %p1041_p12, 1, 0 }
  0x2a   : > { %s1243_s27 = scalar_select %p1045_p13, 1, 0 }
  0x2b   : > { %s578_s28 = sshll.u32 %s175_s23, 1  ;;  %p1052_p2 = pnand %p572_p11, %p143_p0 }
  0x2c   : > { %s920_s30 = smov [#allocation2]   ;;  %s591_s7 = sshll.u32 %s910_s16, 5 }
  0x2d   : > { %s159_s4 = sshll.u32 %s920_s30, 4  ;;  %p666_p1 = pneg %p1052_p2  ;;  %s1056_s4 = int_to_ptr.vmem [resolvable:$true] %s159_s4 }
  0x2e   : > { %s204_s10 = scalar_lea.hbm %s1230_s2, %s591_s7  ;;  %s198_s11 = scalar_lea.vmem [#allocation7], %s578_s28 }
  0x2f   : > { %s206_s22 = sshll.u32 %s198_s11, 4  ;;  %p1066_p3 = pnand %p666_p1, %p1235_p5  ;;  %s207_s22 = int_to_ptr.vmem [resolvable:$true] %s206_s22 }
  0x30   : > { %s789_s19 = scalar_lea.vmem %s207_s22, 32  ;;  %s921_s30 = smov [#allocation7]  }
  0x31   : > { %p790_p6 = scmp.ne.s32.totalorder %s207_s22, %s789_s19  ;;  %s794_s20 = sshll.u32 %s921_s30, 4  ;;  %s795_s20 = int_to_ptr.vmem [resolvable:$false] %s794_s20 }
  0x32   : > { %s796_s1 = scalar_lea.vmem %s795_s20, 64  ;;  %p797_p0 = scmp.lt.s32.totalorder %s207_s22, %s795_s20 }
  0x33   : > { %p792_p9 = pnand %p790_p6, %p750_p8  ;;  %p798_p4 = scmp.lt.s32.totalorder %s796_s1, %s789_s19 }
  0x35   : > { %p793_p11 = pneg %p792_p9  ;;  %p799_p13 = por %p798_p4, %p797_p0 }
  0x37   : > { %p800_p12 = pnand %p799_p13, %p793_p11 }
  0x39   : > { %803 = shalt.err (!%p800_p12)
}
  0x3a   : > { %676 = dma.hbm_to_vmem [thread:$0]  (!%p1007_p7), %s204_s10, 32, %s207_s22, %s1011_s6  }
  0x3b   : > { %p806_p8 = pneg %p1066_p3  ;;  %s815_s28 = scalar_lea.vmem %s1056_s4, 512 }
  0x3c   : > { %p816_p1 = scmp.ne.s32.totalorder %s1056_s4, %s815_s28  ;;  %p823_p5 = scmp.lt.s32.totalorder %s1056_s4, %s1056_s4 }
  0x3d   : > { %p824_p10 = scmp.lt.s32.totalorder %s815_s28, %s815_s28 }
  0x3e   : > { %p818_p6 = pnand %p816_p1, %p806_p8 }
  0x3f   : > { %p825_p4 = por %p824_p10, %p823_p5 }
  0x40   : > { %p819_p9 = pneg %p818_p6 }
  0x42   : > { %p826_p13 = pnand %p825_p4, %p819_p9 }
  0x44   : > { %829 = shalt.err (!%p826_p13)
}
  0x45   : > { %s1246_s1 = smov 16   ;;  %s1247_s5 = smov 256  }
  0x46   : > { %669 = dma.hbm_to_vmem [thread:$0]  (!%p1066_p3), %s1228_s0, 512, %s1056_s4, [#allocation3], %s1247_s5, %s1247_s5, %s1246_s1  }
  0x47   : > { %215 = sbr.rel (%p1052_p2) target bundleno = 397 (0x18d), region = 32  ;;  %p1248_p7 = scmp.eq.s32.totalorder (!%p1052_p2), %s1024_s21, 0 }
  0x4c   : > { %881 = dma.done.wait (%p1248_p7), [#allocation3], 512   ;;  %p1249_p5 = pmov %p1248_p7 }
  0x4d   : > { %s221_s20 = sand.u32 1, %s1024_s21   ;;  %s1099_s7 = sand.u32 1, %s898_s13  }
  0x4e   : > { %883 = vsyncadd (%p1249_p5), [#allocation3], 4294966784  ;;  %s583_s8 = sshll.u32 %s1099_s7, 9  ;;  %s222_s9 = scalar_lea.sflag [#allocation6], %s221_s20 }
  0x4f   : > { %s1102_s10 = scalar_lea.vmem [#allocation5], %s583_s8  ;;  %p1250_p10 = scmp.ne.s32.totalorder %s1241_s25, 0 }
  0x51   : > { %885 = dma.done.wait (%p1250_p10), %s222_s9, 8224  }
  0x52   : > { %887 = vsyncadd (%p1250_p10), %s222_s9, 4294959072  ;;  %v301_v0 = vld [vmem:[%s1102_s10 + $0xf8] sm:$0xff]  ;;  %v300_v1 = vld [vmem:[%s1102_s10 + $0xf0] sm:$0xff]  ;;  %s584_s21 = sshll.u32 %s1099_s7, 1  ;;  %s585_s29 = sshll.u32 %s1099_s7, 4 }
  0x53   : > { %v299_v2 = vld [vmem:[%s1102_s10 + $0xe8] sm:$0xff]  ;;  %346 = vmatprep.subr.mxu0 %v301_v0  ;;  %592 = vmatprep.subr.mxu1 %v301_v0  ;;  %v298_v3 = vld [vmem:[%s1102_s10 + $0xe0] sm:$0xff]  ;;  %v297_v4 = vld [vmem:[%s1102_s10 + $0xd8] sm:$0xff]  ;;  %s234_s25 = scalar_lea.vmem [#allocation7], %s584_s21  ;;  %s587_s4 = sshll.u32 %s906_s15, 7 }
  0x54   : > { %347 = vmatpush1.msra.mxu0 %v300_v1  ;;  %624 = vmatpush1.msra.mxu1 %v300_v1  ;;  %v296_v5 = vld [vmem:[%s1102_s10 + $0xd0] sm:$0xff]  ;;  %v295_v6 = vld [vmem:[%s1102_s10 + $0xc8] sm:$0xff]  ;;  %v294_v7 = vld [vmem:[%s1102_s10 + $0xc0] sm:$0xff]  ;;  %s261_s11 = scalar_lea.vmem [#allocation8], %s585_s29  ;;  %s1178_s28 = scalar_lea.hbm %s1231_s3, %s587_s4 }
  0x55   : > { %348 = vmatprep.subr.mxu0 %v299_v2  ;;  %593 = vmatprep.subr.mxu1 %v299_v2  ;;  %v293_v8 = vld [vmem:[%s1102_s10 + $0xb8] sm:$0xff]  ;;  %v292_v9 = vld [vmem:[%s1102_s10 + $0xb0] sm:$0xff]  ;;  %v291_v10 = vld [vmem:[%s1102_s10 + $0xa8] sm:$0xff]  ;;  %s453_s22 = sshll.u32 %s261_s11, 4  ;;  %s438_s15 = scalar_lea.sflag [#allocation4], %s1099_s7  ;;  %s1180_s22 = int_to_ptr.vmem [resolvable:$true] %s453_s22 }
  0x56   : > { %349 = vmatpush1.msra.mxu0 %v298_v3  ;;  %625 = vmatpush1.msra.mxu1 %v298_v3  ;;  %v290_v11 = vld [vmem:[%s1102_s10 + $0xa0] sm:$0xff]  ;;  %v289_v12 = vld [vmem:[%s1102_s10 + $0x98] sm:$0xff]  ;;  %v288_v13 = vld [vmem:[%s1102_s10 + $0x90] sm:$0xff]  ;;  %s830_s1 = scalar_lea.vmem %s1180_s22, 256  ;;  %p1251_p2 = scmp.ne.s32.totalorder %s1242_s26, 0 }
  0x57   : > { %350 = vmatprep.subr.mxu0 %v297_v4  ;;  %594 = vmatprep.subr.mxu1 %v297_v4  ;;  %v287_v14 = vld [vmem:[%s1102_s10 + $0x88] sm:$0xff]  ;;  %v286_v15 = vld [vmem:[%s1102_s10 + $0x80] sm:$0xff]  ;;  %v285_v16 = vld [vmem:[%s1102_s10 + $0x78] sm:$0xff]  ;;  %v336_v4 = vlaneseq  ;;  %p831_p12 = scmp.ne.s32.totalorder %s1180_s22, %s830_s1  ;;  %s922_s5 = smov [#allocation8]  }
  0x58   : > { %351 = vmatpush1.msra.mxu0 %v296_v5  ;;  %626 = vmatpush1.msra.mxu1 %v296_v5  ;;  %v284_v17 = vld [vmem:[%s1102_s10 + $0x70] sm:$0xff]  ;;  %v283_v18 = vld [vmem:[%s1102_s10 + $0x68] sm:$0xff]  ;;  %v282_v19 = vld [vmem:[%s1102_s10 + $0x60] sm:$0xff]  ;;  %s834_s19 = sshll.u32 %s922_s5, 4  ;;  %s835_s19 = int_to_ptr.vmem [resolvable:$false] %s834_s19 }
  0x59   : > { %352 = vmatprep.subr.mxu0 %v295_v6  ;;  %595 = vmatprep.subr.mxu1 %v295_v6  ;;  %v281_v20 = vld [vmem:[%s1102_s10 + $0x58] sm:$0xff]  ;;  %v280_v21 = vld [vmem:[%s1102_s10 + $0x50] sm:$0xff]  ;;  %v279_v22 = vld [vmem:[%s1102_s10 + $0x48] sm:$0xff]  ;;  %v337_v5 = vshrl.u32 %v336_v4, 7  ;;  %p832_p3 = pnand %p831_p12, %p1251_p2  ;;  %s836_s6 = scalar_lea.vmem %s835_s19, 512 }
  0x5a   : > { %353 = vmatpush1.msra.mxu0 %v294_v7  ;;  %627 = vmatpush1.msra.mxu1 %v294_v7  ;;  %v278_v23 = vld [vmem:[%s1102_s10 + $0x40] sm:$0xff]  ;;  %v277_v24 = vld [vmem:[%s1102_s10 + $0x38] sm:$0xff]  ;;  %v276_v25 = vld [vmem:[%s1102_s10 + $0x30] sm:$0xff]  ;;  %p837_p0 = scmp.lt.s32.totalorder %s1180_s22, %s835_s19  ;;  %p838_p8 = scmp.lt.s32.totalorder %s836_s6, %s830_s1 }
  0x5b   : > { %354 = vmatprep.subr.mxu0 %v293_v8  ;;  %596 = vmatprep.subr.mxu1 %v293_v8  ;;  %v275_v26 = vld [vmem:[%s1102_s10 + $0x28] sm:$0xff]  ;;  %v274_v27 = vld [vmem:[%s1102_s10 + $0x20] sm:$0xff]  ;;  %v273_v28 = vld [vmem:[%s1102_s10 + $0x18] sm:$0xff]  ;;  %v342_v6 = vsub.s32 1, %v337_v5  ;;  %p833_p11 = pneg %p832_p3 }
  0x5c   : > { %355 = vmatpush1.msra.mxu0 %v292_v9  ;;  %628 = vmatpush1.msra.mxu1 %v292_v9  ;;  %v272_v29 = vld [vmem:[%s1102_s10 + $0x10] sm:$0xff]  ;;  %v271_v30 = vld [vmem:[%s1102_s10 + $0x8] sm:$0xff]  ;;  %v270_v31 = vld [vmem:[%s1102_s10] sm:$0xff]  ;;  %p839_p1 = por %p838_p8, %p837_p0 }
  0x5d   : > { %356 = vmatprep.subr.mxu0 %v291_v10  ;;  %597 = vmatprep.subr.mxu1 %v291_v10  ;;  %v333_v32 = vld [vmem:[%s1102_s10 + $0x1f8] sm:$0xff]  ;;  %v332_v33 = vld [vmem:[%s1102_s10 + $0x1f0] sm:$0xff]  ;;  %v331_v34 = vld [vmem:[%s1102_s10 + $0x1e8] sm:$0xff] }
  0x5e   : > { %357 = vmatpush1.msra.mxu0 %v290_v11  ;;  %629 = vmatpush1.msra.mxu1 %v290_v11  ;;  %v330_v35 = vld [vmem:[%s1102_s10 + $0x1e0] sm:$0xff]  ;;  %v329_v36 = vld [vmem:[%s1102_s10 + $0x1d8] sm:$0xff]  ;;  %v328_v37 = vld [vmem:[%s1102_s10 + $0x1d0] sm:$0xff]  ;;  %p840_p6 = pnand %p839_p1, %p833_p11 }
  0x5f   : > { %358 = vmatprep.subr.mxu0 %v289_v12  ;;  %598 = vmatprep.subr.mxu1 %v289_v12  ;;  %v327_v38 = vld [vmem:[%s1102_s10 + $0x1c8] sm:$0xff]  ;;  %v326_v39 = vld [vmem:[%s1102_s10 + $0x1c0] sm:$0xff]  ;;  %v325_v40 = vld [vmem:[%s1102_s10 + $0x1b8] sm:$0xff] }
  0x60   : > { %359 = vmatpush1.msra.mxu0 %v288_v13  ;;  %630 = vmatpush1.msra.mxu1 %v288_v13  ;;  %v324_v41 = vld [vmem:[%s1102_s10 + $0x1b0] sm:$0xff]  ;;  %v323_v42 = vld [vmem:[%s1102_s10 + $0x1a8] sm:$0xff]  ;;  %v322_v43 = vld [vmem:[%s1102_s10 + $0x1a0] sm:$0xff] }
  0x61   : > { %360 = vmatprep.subr.mxu0 %v287_v14  ;;  %599 = vmatprep.subr.mxu1 %v287_v14  ;;  %v321_v44 = vld [vmem:[%s1102_s10 + $0x198] sm:$0xff]  ;;  %v320_v45 = vld [vmem:[%s1102_s10 + $0x190] sm:$0xff]  ;;  %v319_v46 = vld [vmem:[%s1102_s10 + $0x188] sm:$0xff] }
  0x62   : > { %361 = vmatpush1.msra.mxu0 %v286_v15  ;;  %631 = vmatpush1.msra.mxu1 %v286_v15  ;;  %v318_v47 = vld [vmem:[%s1102_s10 + $0x180] sm:$0xff]  ;;  %v317_v48 = vld [vmem:[%s1102_s10 + $0x178] sm:$0xff]  ;;  %v316_v49 = vld [vmem:[%s1102_s10 + $0x170] sm:$0xff] }
  0x63   : > { %362 = vmatprep.subr.mxu0 %v285_v16  ;;  %600 = vmatprep.subr.mxu1 %v285_v16  ;;  %v315_v50 = vld [vmem:[%s1102_s10 + $0x168] sm:$0xff]  ;;  %v314_v51 = vld [vmem:[%s1102_s10 + $0x160] sm:$0xff]  ;;  %v313_v52 = vld [vmem:[%s1102_s10 + $0x158] sm:$0xff] }
  0x64   : > { %363 = vmatpush1.msra.mxu0 %v284_v17  ;;  %632 = vmatpush1.msra.mxu1 %v284_v17  ;;  %v312_v53 = vld [vmem:[%s1102_s10 + $0x150] sm:$0xff]  ;;  %v311_v54 = vld [vmem:[%s1102_s10 + $0x148] sm:$0xff]  ;;  %v310_v55 = vld [vmem:[%s1102_s10 + $0x140] sm:$0xff] }
  0x65   : > { %364 = vmatprep.subr.mxu0 %v283_v18  ;;  %601 = vmatprep.subr.mxu1 %v283_v18  ;;  %v309_v56 = vld [vmem:[%s1102_s10 + $0x138] sm:$0xff]  ;;  %v308_v57 = vld [vmem:[%s1102_s10 + $0x130] sm:$0xff]  ;;  %v307_v58 = vld [vmem:[%s1102_s10 + $0x128] sm:$0xff] }
  0x66   : > { %365 = vmatpush1.msra.mxu0 %v282_v19  ;;  %633 = vmatpush1.msra.mxu1 %v282_v19  ;;  %v306_v59 = vld [vmem:[%s1102_s10 + $0x120] sm:$0xff]  ;;  %v305_v60 = vld [vmem:[%s1102_s10 + $0x118] sm:$0xff]  ;;  %v304_v61 = vld [vmem:[%s1102_s10 + $0x110] sm:$0xff] }
  0x67   : > { %366 = vmatprep.subr.mxu0 %v281_v20  ;;  %602 = vmatprep.subr.mxu1 %v281_v20  ;;  %v303_v62 = vld [vmem:[%s1102_s10 + $0x108] sm:$0xff]  ;;  %v302_v63 = vld [vmem:[%s1102_s10 + $0x100] sm:$0xff]  ;;  %v269_v1 = vld [vmem:[#allocation2 + $0x18] sm:$0xff] }
  0x68   : > { %367 = vmatpush1.msra.mxu0 %v280_v21  ;;  %634 = vmatpush1.msra.mxu1 %v280_v21  ;;  %v267_v0 = vld [vmem:[#allocation2 + $0x8] sm:$0xff]  ;;  %v266_v2 = vld [vmem:[#allocation2] sm:$0xff]  ;;  %v268_v3 = vld [vmem:[#allocation2 + $0x10] sm:$0xff] }
  0x69   : > { %368 = vmatprep.subr.mxu0 %v279_v22  ;;  %603 = vmatprep.subr.mxu1 %v279_v22  ;;  %v334_v7 = vld [vmem:[%s234_s25] sm:$0x3] }
  0x6a   : > { %369 = vmatpush1.msra.mxu0 %v278_v23  ;;  %635 = vmatpush1.msra.mxu1 %v278_v23  ;;  %v343_v8 = vrot.slane %v334_v7, %v342_v6  ;;  %v338_v23 = vsub.s32 0, %v337_v5 }
  0x6b   : > { %370 = vmatprep.subr.mxu0 %v277_v24  ;;  %604 = vmatprep.subr.mxu1 %v277_v24 }
  0x6c   : > { %371 = vmatpush1.msra.mxu0 %v276_v25  ;;  %636 = vmatpush1.msra.mxu1 %v276_v25  ;;  %v339_v24 = vrot.slane %v334_v7, %v338_v23 }
  0x6d   : > { %372 = vmatprep.subr.mxu0 %v275_v26  ;;  %605 = vmatprep.subr.mxu1 %v275_v26 }
  0x6e   : > { %373 = vmatpush1.msra.mxu0 %v274_v27  ;;  %637 = vmatpush1.msra.mxu1 %v274_v27 }
  0x6f   : > { %374 = vmatprep.subr.mxu0 %v273_v28  ;;  %606 = vmatprep.subr.mxu1 %v273_v28 }
  0x70   : > { %375 = vmatpush1.msra.mxu0 %v272_v29  ;;  %638 = vmatpush1.msra.mxu1 %v272_v29 }
  0x71   : > { %376 = vmatprep.subr.mxu0 %v271_v30  ;;  %607 = vmatprep.subr.mxu1 %v271_v30 }
  0x72   : > { %377 = vmatpush1.msra.mxu0 %v270_v31  ;;  %639 = vmatpush1.msra.mxu1 %v270_v31 }
  0x73   : > { %378 = vmatprep.subr.mxu0 %v333_v32  ;;  %608 = vmatprep.subr.mxu1 %v333_v32 }
  0x74   : > { %379 = vmatpush2.msra.mxu0 %v332_v33  ;;  %640 = vmatpush2.msra.mxu1 %v332_v33 }
  0x75   : > { %380 = vmatprep.subr.mxu0 %v331_v34  ;;  %609 = vmatprep.subr.mxu1 %v331_v34 }
  0x76   : > { %381 = vmatpush2.msra.mxu0 %v330_v35  ;;  %641 = vmatpush2.msra.mxu1 %v330_v35 }
  0x77   : > { %382 = vmatprep.subr.mxu0 %v329_v36  ;;  %610 = vmatprep.subr.mxu1 %v329_v36 }
  0x78   : > { %383 = vmatpush2.msra.mxu0 %v328_v37  ;;  %642 = vmatpush2.msra.mxu1 %v328_v37 }
  0x79   : > { %384 = vmatprep.subr.mxu0 %v327_v38  ;;  %611 = vmatprep.subr.mxu1 %v327_v38 }
  0x7a   : > { %385 = vmatpush2.msra.mxu0 %v326_v39  ;;  %643 = vmatpush2.msra.mxu1 %v326_v39 }
  0x7b   : > { %386 = vmatprep.subr.mxu0 %v325_v40  ;;  %612 = vmatprep.subr.mxu1 %v325_v40 }
  0x7c   : > { %387 = vmatpush2.msra.mxu0 %v324_v41  ;;  %644 = vmatpush2.msra.mxu1 %v324_v41 }
  0x7d   : > { %388 = vmatprep.subr.mxu0 %v323_v42  ;;  %613 = vmatprep.subr.mxu1 %v323_v42 }
  0x7e   : > { %389 = vmatpush2.msra.mxu0 %v322_v43  ;;  %645 = vmatpush2.msra.mxu1 %v322_v43 }
  0x7f   : > { %390 = vmatprep.subr.mxu0 %v321_v44  ;;  %614 = vmatprep.subr.mxu1 %v321_v44 }
  0x80   : > { %391 = vmatpush2.msra.mxu0 %v320_v45  ;;  %646 = vmatpush2.msra.mxu1 %v320_v45 }
  0x81   : > { %392 = vmatprep.subr.mxu0 %v319_v46  ;;  %615 = vmatprep.subr.mxu1 %v319_v46 }
  0x82   : > { %393 = vmatpush2.msra.mxu0 %v318_v47  ;;  %647 = vmatpush2.msra.mxu1 %v318_v47 }
  0x83   : > { %394 = vmatprep.subr.mxu0 %v317_v48  ;;  %616 = vmatprep.subr.mxu1 %v317_v48 }
  0x84   : > { %395 = vmatpush2.msra.mxu0 %v316_v49  ;;  %648 = vmatpush2.msra.mxu1 %v316_v49 }
  0x85   : > { %396 = vmatprep.subr.mxu0 %v315_v50  ;;  %617 = vmatprep.subr.mxu1 %v315_v50 }
  0x86   : > { %397 = vmatpush2.msra.mxu0 %v314_v51  ;;  %649 = vmatpush2.msra.mxu1 %v314_v51 }
  0x87   : > { %398 = vmatprep.subr.mxu0 %v313_v52  ;;  %618 = vmatprep.subr.mxu1 %v313_v52 }
  0x88   : > { %399 = vmatpush2.msra.mxu0 %v312_v53  ;;  %650 = vmatpush2.msra.mxu1 %v312_v53 }
  0x89   : > { %400 = vmatprep.subr.mxu0 %v311_v54  ;;  %619 = vmatprep.subr.mxu1 %v311_v54 }
  0x8a   : > { %401 = vmatpush2.msra.mxu0 %v310_v55  ;;  %651 = vmatpush2.msra.mxu1 %v310_v55 }
  0x8b   : > { %402 = vmatprep.subr.mxu0 %v309_v56  ;;  %620 = vmatprep.subr.mxu1 %v309_v56 }
  0x8c   : > { %403 = vmatpush2.msra.mxu0 %v308_v57  ;;  %652 = vmatpush2.msra.mxu1 %v308_v57 }
  0x8d   : > { %404 = vmatprep.subr.mxu0 %v307_v58  ;;  %621 = vmatprep.subr.mxu1 %v307_v58 }
  0x8e   : > { %405 = vmatpush2.msra.mxu0 %v306_v59  ;;  %653 = vmatpush2.msra.mxu1 %v306_v59 }
  0x8f   : > { %406 = vmatprep.subr.mxu0 %v305_v60  ;;  %622 = vmatprep.subr.mxu1 %v305_v60 }
  0x90   : > { %407 = vmatpush2.msra.mxu0 %v304_v61  ;;  %654 = vmatpush2.msra.mxu1 %v304_v61 }
  0x91   : > { %408 = vmatprep.subr.mxu0 %v303_v62  ;;  %623 = vmatprep.subr.mxu1 %v303_v62 }
  0x92   : > { %409 = vmatpush2.msra.mxu0 %v302_v63  ;;  %655 = vmatpush2.msra.mxu1 %v302_v63 }
  0x93   : > { %410 = vmatprep.mubr.f32.mxu0 %v267_v0  ;;  %416 = vmatprep.mubr.f32.mxu1 %v269_v1 }
  0x94   : > { %411 = vmatmul.mubr.f32.vlgmr.msra.gmra.mxu0 %v266_v2  ;;  %417 = vmatmul.mubr.f32.vlgmr.msra.gmra.mxu1 %v268_v3 }
 0x154   : > { %v412_v9 = vpop.f32.mrf.mxu0  ;;  %v418_v10 = vpop.f32.mrf.mxu1 }
 0x155   : > { %v413_v25 = vadd.f32 %v412_v9, %v339_v24  ;;  %v419_v27 = vadd.f32 %v418_v10, %v339_v24 }
 0x156   : > { %v414_v11 = vpop.f32.mrf.mxu0  ;;  %v420_v12 = vpop.f32.mrf.mxu1 }
 0x157   : > { %v415_v13 = vadd.f32 %v414_v11, %v343_v8  ;;  %v421_v14 = vadd.f32 %v420_v12, %v343_v8 }
 0x159   : > { %v423_v15 = vsub.f32 0.0, %v415_v13  ;;  %v424_v16 = vsub.f32 0.0, %v421_v14 }
 0x15b   : > { %v425_v17 = vmul.f32 1.442695, %v423_v15  ;;  %v427_v18 = vmul.f32 1.442695, %v424_v16 }
 0x15d   : > { %740 = vpow2.f32 %v425_v17 }
 0x15e   : > { %742 = vpow2.f32 %v427_v18 }
 0x16a   : > { %v741_v19 = vpop.eup %740 }
 0x16b   : > { %v743_v20 = vpop.eup %742  ;;  %v429_v21 = vadd.f32 1.0, %v741_v19 }
 0x16c   : > { %v430_v22 = vadd.f32 1.0, %v743_v20 }
 0x16d   : > { %744 = vrcp.f32 %v429_v21 }
 0x16e   : > { %746 = vrcp.f32 %v430_v22 }
 0x17a   : > { %v745_v26 = vpop.eup %744 }
 0x17b   : > { %v747_v28 = vpop.eup %746  ;;  %v433_v29 = vmul.f32 %v745_v26, %v413_v25 }
 0x17c   : > { %v434_v30 = vmul.f32 %v747_v28, %v419_v27 }
 0x17d   : > { %435 = vst [vmem:[%s261_s11] sm:$0xff] %v433_v29 }
 0x17e   : > { %436 = vst [vmem:[%s261_s11 + $0x8] sm:$0xff] %v434_v30 }
 0x17f   : > { %843 = shalt.err (!%p840_p6)
}
 0x180   : > { %s844_s20 = scalar_lea.hbm %s1178_s28, 256  ;;  %s848_s10 = scalar_lea.hbm %s1231_s3, 512 }
 0x181   : > { %p845_p9 = scmp.ne.s32.totalorder %s1178_s28, %s844_s20  ;;  %p849_p7 = scmp.lt.s32.totalorder %s1178_s28, %s1231_s3 }
 0x182   : > { %p850_p5 = scmp.lt.s32.totalorder %s848_s10, %s844_s20 }
 0x183   : > { %p846_p4 = pnand %p845_p9, %p1251_p2 }
 0x184   : > { %p851_p10 = por %p850_p5, %p849_p7 }
 0x185   : > { %p847_p13 = pneg %p846_p4 }
 0x187   : > { %p852_p12 = pnand %p851_p10, %p847_p13 }
 0x189   : > { %855 = shalt.err (!%p852_p12)
}
 0x18a   : > { %s923_s29 = smov 128   ;;  %s924_s4 = smov 256  }
 0x18b   : > { %s925_s11 = smov 8  }
 0x18c   : > { %664 = dma.vmem_to_hbm [thread:$0]  (%p1251_p2), %s1180_s22, 256, %s1178_s28, %s438_s15, %s923_s29, %s924_s4, %s925_s11  }
 0x18d PF: > { %s468_s23 = sand.u32 1, %s894_s12   ;;  %p1252_p3 = scmp.ne.s32.totalorder %s1243_s27, 0 }
 0x18e   : > { %p1253_p11 = scmp.ge.s32.totalorder %s914_s17, 2  ;;  %s469_s30 = scalar_lea.sflag [#allocation4], %s468_s23 }
 0x190   : > { %p678_p0 = pnand %p1253_p11, %p1252_p3 }
 0x192   : > { %p679_p8 = pneg %p678_p0 }
 0x194   : > { %889 = dma.done.wait (%p679_p8), %s469_s30, 256  }
 0x195   : > { %891 = vsyncadd (%p679_p8), %s469_s30, 4294967040  ;;  %s20_s17 = sadd.s32 1, %s914_s17   ;;  %s1254_s12 = smov %s898_s13 }
 0x196   : > { %p17_p1 = scmp.ge.s32.totalorder %s20_s17, 4   ;;  %s1255_s13 = smov %s902_s14 }
 0x197   : > { %s1256_s14 = smov %s997_s24  ;;  %s1257_s15 = smov %s910_s16 }
 0x198   : > { %s1258_s16 = smov %s1260_s18  ;;  %19 = sbr.rel (!%p17_p1) target bundleno = 9 (0x9), region = 94 }
 0x19d   :  { %474 = vsyncpa [#allocation3], 1 }
 0x19e   :  { %476 = vsyncpa [#allocation3 + $0x1], 1 }
 0x19f   :  { %477 = vsyncpa [#allocation6], 1 }
 0x1a0   :  { %479 = vsyncpa [#allocation6 + $0x1], 1 }
 0x1a1   :  { %480 = vsyncpa [#allocation4], 1 }
 0x1a2   :  { %482 = vsyncpa [#allocation4 + $0x1], 1 }

</bundles_post_ra>
